<compile_context>
chip_gen: v7x
topology: tpu7x:2x2x1
jax: 0.10.0
libtpu: 0.0.40
codegen_flags: <defaults>
</compile_context>

<pallas_src>
import jax
import jax.numpy as jnp
from jax.experimental import pallas as pl
from jax.experimental.pallas import tpu as pltpu

BN_EPS = 1e-5
NEG_SLOPE = 0.2  # ConvBNLRelu default neg_slope


def conv_bn_lrelu_kernel(x_ref, wb_ref, cb_ref, g_ref, b_ref, proj_ref, o_ref):
    # x_ref:    (N, H, W*Cin)         lane-dense activations
    # wb_ref:   (3*W*Cin, W*Cout)     fused block-banded conv weights (ky taps
    #                                 stacked on K; kx shift and x-boundary
    #                                 zero padding folded into the band)
    # cb_ref:   (1, W*Cout)           conv bias, tiled W times along lanes
    # g_ref:    (1, W*Cout)           BN gamma, tiled W times
    # b_ref:    (1, W*Cout)           BN beta, tiled W times
    # proj_ref: (W*Cout, W*Cout)      channel fold+broadcast projector,
    #                                 pre-scaled by 1/(N*H*W)
    N, H, WCin = x_ref.shape
    WCout = o_ref.shape[-1]

    xf = x_ref[...].astype(jnp.float32)
    zrow = jnp.zeros((N, 1, WCin), jnp.float32)
    # Output row h sees input rows h-1 / h / h+1 (zero at the y boundaries).
    x_up = jnp.concatenate([zrow, xf[:, :H - 1, :]], axis=1)   # ky = 0 tap
    x_dn = jnp.concatenate([xf[:, 1:, :], zrow], axis=1)       # ky = 2 tap
    lhs = jnp.concatenate([x_up, xf, x_dn], axis=-1).reshape(N * H, 3 * WCin)

    # One fused K = 3*W*Cin MXU matmul; conv bias added in the epilogue.
    acc = (jnp.dot(lhs, wb_ref[...], preferred_element_type=jnp.float32)
           + cb_ref[...].astype(jnp.float32))                   # (N*H, W*Cout)

    # Training-mode BatchNorm2d: one-pass batch stats (biased variance).
    # Stack sum / sum-of-squares and fold+re-broadcast over the W positions per
    # channel with a single tiny MXU matmul (projector pre-scaled by 1/count).
    s = jnp.concatenate([jnp.sum(acc, axis=0, keepdims=True),
                         jnp.sum(acc * acc, axis=0, keepdims=True)],
                        axis=0)                                  # (2, W*Cout)
    stats = jnp.dot(s, proj_ref[...], preferred_element_type=jnp.float32)
    mean_t = stats[0:1, :]
    var_t = stats[1:2, :] - mean_t * mean_t
    scale_t = g_ref[...] * jax.lax.rsqrt(var_t + BN_EPS)
    shift_t = b_ref[...] - mean_t * scale_t
    y = acc * scale_t + shift_t

    # LeakyReLU(neg_slope=0.2)
    y = jnp.where(y >= 0, y, NEG_SLOPE * y)
    o_ref[...] = y.reshape(N, H, WCout).astype(o_ref.dtype)


def prepare_params(params, x_shape):
    """Build the kernel's constant operands ONCE per weight set / input shape.

    Keeps the banded-weight / projector construction off the per-call path.
    """
    N, Cin, H, W = x_shape
    Cout = params["conv_w"].shape[0]

    # torch Conv2d weight (Cout, Cin, kh, kw) -> (ky, kx, Cin, Cout)
    w_t = jnp.transpose(params["conv_w"], (2, 3, 1, 0)).astype(jnp.float32)

    # Block-banded weights: wb[ky, xp*Cin+ci, x*Cout+co] = w[ky, xp-x+1, ci, co]
    # when |xp - x| <= 1, else 0 (x-boundary zero padding is implicit).  The
    # three ky taps are then stacked along K for the single fused matmul.
    diff = jnp.arange(W)[:, None] - jnp.arange(W)[None, :]               # xp - x
    sel = (diff[None, :, :] == (jnp.arange(3) - 1)[:, None, None])
    sel = sel.astype(jnp.float32)                                        # (kx, xp, x)
    wb = jnp.einsum('kpx,ykio->ypixo', sel, w_t).reshape(3 * W * Cin, W * Cout)

    # Per-channel params tiled W times so they line up with the lane-dense axis.
    cb = jnp.tile(params["conv_b"].reshape(1, Cout).astype(jnp.float32), (1, W))
    g = jnp.tile(params["bn_w"].reshape(1, Cout).astype(jnp.float32), (1, W))
    b = jnp.tile(params["bn_b"].reshape(1, Cout).astype(jnp.float32), (1, W))

    # Channel fold+broadcast projector, pre-scaled by 1/(N*H*W): lane j of
    # (row_sums @ proj) holds the per-channel mean for channel (j % Cout).
    ch = jnp.arange(W * Cout) % Cout
    proj = (ch[:, None] == ch[None, :]).astype(jnp.float32) / float(N * H * W)

    return {"wb": wb, "cb": cb, "g": g, "b": b, "proj": proj,
            "Cout": Cout}


@jax.jit
def conv_bn_lrelu_forward(x_nchw, prep):
    """ConvBNLRelu forward. x_nchw: (N, Cin, H, W) -> (N, Cout, H, W)."""
    N, Cin, H, W = x_nchw.shape
    Cout = prep["wb"].shape[-1] // W

    # NCHW -> lane-dense (N, H, W*Cin): free layout plumbing in the wrapper.
    x = jnp.transpose(x_nchw, (0, 2, 3, 1)).reshape(N, H, W * Cin)

    vmem = pl.BlockSpec(memory_space=pltpu.MemorySpace.VMEM)
    out = pl.pallas_call(
        conv_bn_lrelu_kernel,
        out_shape=jax.ShapeDtypeStruct((N, H, W * Cout), x_nchw.dtype),
        in_specs=[vmem] * 6,
        out_specs=vmem,
        compiler_params=pltpu.CompilerParams(vmem_limit_bytes=32 * 1024 * 1024),
    )(x, prep["wb"], prep["cb"], prep["g"], prep["b"], prep["proj"])
    # TODO(synk): at production shapes, tile over N*H rows with a
    # ("parallel", "arbitrary") grid (cross-tile BN stat reduction) to use both
    # v7x TensorCores, pipeline HBM->VMEM DMA, and stay under v7x's 64 MiB VMEM.

    # lane-dense -> NCHW
    return jnp.transpose(out.reshape(N, H, W, Cout), (0, 3, 1, 2))


def conv_bn_lrelu_ref(x, params):
    """Pure-JAX reference (NCHW), mirrors the PyTorch forward in training mode."""
    out = jax.lax.conv_general_dilated(
        x, params["conv_w"], window_strides=(1, 1), padding="SAME",
        dimension_numbers=("NCHW", "OIHW", "NCHW"))
    out = out + params["conv_b"].reshape(1, -1, 1, 1)
    mean = out.mean(axis=(0, 2, 3), keepdims=True)
    var = jnp.square(out - mean).mean(axis=(0, 2, 3), keepdims=True)
    out = ((out - mean) / jnp.sqrt(var + BN_EPS)
           * params["bn_w"].reshape(1, -1, 1, 1)
           + params["bn_b"].reshape(1, -1, 1, 1))
    return jnp.where(out >= 0, out, NEG_SLOPE * out)


if __name__ == "__main__":
    # ConvBNLRelu(inf=8, outf=8); W * C = 128 so the lane axis is fully dense.
    N, Cin, Cout, H, W = 2, 8, 8, 16, 16
    key = jax.random.PRNGKey(0)
    ks = jax.random.split(key, 5)
    params = {
        "conv_w": 0.1 * jax.random.normal(ks[0], (Cout, Cin, 3, 3), jnp.float32),
        "conv_b": 0.1 * jax.random.normal(ks[1], (Cout,), jnp.float32),
        "bn_w": 1.0 + 0.1 * jax.random.normal(ks[2], (Cout,), jnp.float32),
        "bn_b": 0.1 * jax.random.normal(ks[3], (Cout,), jnp.float32),
    }
    x = jax.random.normal(ks[4], (N, Cin, H, W), jnp.float32)

    # Constants built once per weight set (kept off the per-call path).
    prep = jax.tree_util.tree_map(jax.block_until_ready,
                                  prepare_params(params, x.shape))

    out = jax.block_until_ready(conv_bn_lrelu_forward(x, prep))
    assert out.shape == (N, Cout, H, W) and out.dtype == jnp.float32

    ref = conv_bn_lrelu_ref(x, params)
    err = float(jnp.max(jnp.abs(out - ref)))
    if err > 2e-4:
        raise AssertionError(f"Pallas kernel mismatch vs reference: max abs err {err}")
    print("KERNEL_OK")
</pallas_src>

<mosaic_0001>
module attributes {stable_mosaic.version = 11 : i64} {
  func.func @conv_bn_lrelu_kernel(%arg0: memref<2x16x128xf32, #tpu.memory_space<vmem>>, %arg1: memref<384x128xf32, #tpu.memory_space<vmem>>, %arg2: memref<1x128xf32, #tpu.memory_space<vmem>>, %arg3: memref<1x128xf32, #tpu.memory_space<vmem>>, %arg4: memref<1x128xf32, #tpu.memory_space<vmem>>, %arg5: memref<128x128xf32, #tpu.memory_space<vmem>>, %arg6: memref<2x16x128xf32, #tpu.memory_space<vmem>>) attributes {dimension_semantics = [], scalar_prefetch = 0 : i64, scratch_operands = 0 : i64, tpu.core_type = #tpu.core_type<tc>} {
    %c0 = arith.constant 0 : index
    %c0_0 = arith.constant 0 : index
    %c0_1 = arith.constant 0 : index
    %0 = vector.load %arg0[%c0, %c0_0, %c0_1] : memref<2x16x128xf32, #tpu.memory_space<vmem>>, vector<2x16x128xf32>
    %cst = arith.constant 0.000000e+00 : f32
    %1 = vector.broadcast %cst : f32 to vector<2x1x128xf32>
    %2 = vector.extract_strided_slice %0 {offsets = [0, 0, 0], sizes = [2, 15, 128], strides = [1, 1, 1]} : vector<2x16x128xf32> to vector<2x15x128xf32>
    %3 = tpu.concatenate %1, %2 in 1 : vector<2x1x128xf32>, vector<2x15x128xf32> -> vector<2x16x128xf32>
    %4 = vector.extract_strided_slice %0 {offsets = [0, 1, 0], sizes = [2, 15, 128], strides = [1, 1, 1]} : vector<2x16x128xf32> to vector<2x15x128xf32>
    %5 = tpu.concatenate %4, %1 in 1 : vector<2x15x128xf32>, vector<2x1x128xf32> -> vector<2x16x128xf32>
    %6 = tpu.concatenate %3, %0, %5 in 2 : vector<2x16x128xf32>, vector<2x16x128xf32>, vector<2x16x128xf32> -> vector<2x16x384xf32>
    %7 = vector.shape_cast %6 : vector<2x16x384xf32> to vector<32x384xf32>
    %c0_2 = arith.constant 0 : index
    %c0_3 = arith.constant 0 : index
    %8 = vector.load %arg1[%c0_2, %c0_3] : memref<384x128xf32, #tpu.memory_space<vmem>>, vector<384x128xf32>
    %cst_4 = arith.constant dense<0.000000e+00> : vector<32x128xf32>
    %9 = tpu.matmul %7, %8, %cst_4 {dimension_numbers = #tpu.dot_dimension_numbers<[1], [0], [0], [1], [0, 0, 1, 1], [], []>} : vector<32x384xf32>, vector<384x128xf32>, vector<32x128xf32> -> vector<32x128xf32>
    %c0_5 = arith.constant 0 : index
    %c0_6 = arith.constant 0 : index
    %10 = vector.load %arg2[%c0_5, %c0_6] : memref<1x128xf32, #tpu.memory_space<vmem>>, vector<1x128xf32>
    %11 = vector.broadcast %10 : vector<1x128xf32> to vector<32x128xf32>
    %12 = arith.addf %9, %11 : vector<32x128xf32>
    %cst_7 = arith.constant dense<0.000000e+00> : vector<128xf32>
    %13 = vector.multi_reduction <add>, %12, %cst_7 [0] : vector<32x128xf32> to vector<128xf32>
    %14 = vector.shape_cast %13 : vector<128xf32> to vector<1x128xf32>
    %15 = arith.mulf %12, %12 : vector<32x128xf32>
    %cst_8 = arith.constant dense<0.000000e+00> : vector<128xf32>
    %16 = vector.multi_reduction <add>, %15, %cst_8 [0] : vector<32x128xf32> to vector<128xf32>
    %17 = vector.shape_cast %16 : vector<128xf32> to vector<1x128xf32>
    %18 = tpu.concatenate %14, %17 in 0 : vector<1x128xf32>, vector<1x128xf32> -> vector<2x128xf32>
    %c0_9 = arith.constant 0 : index
    %c0_10 = arith.constant 0 : index
    %19 = vector.load %arg5[%c0_9, %c0_10] : memref<128x128xf32, #tpu.memory_space<vmem>>, vector<128x128xf32>
    %cst_11 = arith.constant dense<0.000000e+00> : vector<2x128xf32>
    %20 = tpu.matmul %18, %19, %cst_11 {dimension_numbers = #tpu.dot_dimension_numbers<[1], [0], [0], [1], [0, 0, 1, 1], [], []>} : vector<2x128xf32>, vector<128x128xf32>, vector<2x128xf32> -> vector<2x128xf32>
    %21 = vector.extract_strided_slice %20 {offsets = [0, 0], sizes = [1, 128], strides = [1, 1]} : vector<2x128xf32> to vector<1x128xf32>
    %22 = vector.extract_strided_slice %20 {offsets = [1, 0], sizes = [1, 128], strides = [1, 1]} : vector<2x128xf32> to vector<1x128xf32>
    %23 = arith.mulf %21, %21 : vector<1x128xf32>
    %24 = arith.subf %22, %23 : vector<1x128xf32>
    %c0_12 = arith.constant 0 : index
    %c0_13 = arith.constant 0 : index
    %25 = vector.load %arg3[%c0_12, %c0_13] : memref<1x128xf32, #tpu.memory_space<vmem>>, vector<1x128xf32>
    %cst_14 = arith.constant 9.99999974E-6 : f32
    %26 = vector.broadcast %cst_14 : f32 to vector<1x128xf32>
    %27 = arith.addf %24, %26 : vector<1x128xf32>
    %28 = math.rsqrt %27 : vector<1x128xf32>
    %29 = arith.mulf %25, %28 : vector<1x128xf32>
    %c0_15 = arith.constant 0 : index
    %c0_16 = arith.constant 0 : index
    %30 = vector.load %arg4[%c0_15, %c0_16] : memref<1x128xf32, #tpu.memory_space<vmem>>, vector<1x128xf32>
    %31 = arith.mulf %21, %29 : vector<1x128xf32>
    %32 = arith.subf %30, %31 : vector<1x128xf32>
    %33 = vector.broadcast %29 : vector<1x128xf32> to vector<32x128xf32>
    %34 = arith.mulf %12, %33 : vector<32x128xf32>
    %35 = vector.broadcast %32 : vector<1x128xf32> to vector<32x128xf32>
    %36 = arith.addf %34, %35 : vector<32x128xf32>
    %cst_17 = arith.constant 0.000000e+00 : f32
    %37 = vector.broadcast %cst_17 : f32 to vector<32x128xf32>
    %38 = arith.cmpf oge, %36, %37 : vector<32x128xf32>
    %cst_18 = arith.constant 2.000000e-01 : f32
    %39 = vector.broadcast %cst_18 : f32 to vector<32x128xf32>
    %40 = arith.mulf %39, %36 : vector<32x128xf32>
    %41 = arith.select %38, %36, %40 : vector<32x128xi1>, vector<32x128xf32>
    %42 = vector.shape_cast %41 : vector<32x128xf32> to vector<2x16x128xf32>
    %c0_19 = arith.constant 0 : index
    %c0_20 = arith.constant 0 : index
    %c0_21 = arith.constant 0 : index
    %43 = vector.load %arg6[%c0_19, %c0_20, %c0_21] : memref<2x16x128xf32, #tpu.memory_space<vmem>>, vector<2x16x128xf32>
    tpu.vector_store %arg6[%c0_19, %c0_20, %c0_21], %42 {strides = array<i32>} : memref<2x16x128xf32, #tpu.memory_space<vmem>>, vector<2x16x128xf32>,
    return
  }
}

</mosaic_0001>

<bundles_post_ra>
// kernel: conv_bn_lrelu_forward.1
= control target key start
LH: loop header
LB: loop body
LE: loop exit
PB: predicated region body
PF: predicated region fallthrough
CT: control target
= control target key end

     0   :  { %vm44_vm0 = vcmask 1046528   ;;  %vm31_vm1 = vcmask 1040384   ;;  %vm716_vm3 = vmmov 0   ;;  %s998_s1 = inlined_call_operand.vmem [shape: f32[384,128], index: 1, kind: input, shape index: {}]   ;;  %s999_s0 = inlined_call_operand.vmem [shape: f32[2,16,128], index: 0, kind: input, shape index: {}]   ;;  %s1000_s5 = inlined_call_operand.vmem [shape: f32[128,128], index: 5, kind: input, shape index: {}]   ;;  %s1001_s2 = inlined_call_operand.vmem [shape: f32[1,128], index: 2, kind: input, shape index: {}]   ;;  %s1002_s3 = inlined_call_operand.vmem [shape: f32[1,128], index: 3, kind: input, shape index: {}]   ;;  %s1003_s4 = inlined_call_operand.vmem [shape: f32[1,128], index: 4, kind: input, shape index: {}]   ;;  %s1004_s6 = inlined_call_operand.vmem [shape: f32[2,16,128], index: 6, kind: output, shape index: {}]  }
   0x1   :  { %v73_v0 = vld [vmem:[%s998_s1 + $0x80] sm:$0xff]  ;;  %v74_v1 = vld [vmem:[%s998_s1 + $0x88] sm:$0xff]  ;;  %v75_v5 = vld [vmem:[%s998_s1 + $0x90] sm:$0xff] }
   0x2   :  { %v57_v2 = vld [vmem:[%s998_s1] sm:$0xff]  ;;  %v621_v3 = vpack.c.bf16 %v74_v1, %v73_v0  ;;  %v58_v4 = vld [vmem:[%s998_s1 + $0x8] sm:$0xff]  ;;  %v76_v6 = vld [vmem:[%s998_s1 + $0x98] sm:$0xff] }
   0x3   :  { %v623_v7 = vpack.c.bf16 %v58_v4, %v57_v2  ;;  %v625_v8 = vpack.c.bf16 %v76_v6, %v75_v5  ;;  %v89_v9 = vld [vmem:[%s998_s1 + $0x100] sm:$0xff]  ;;  %v90_v10 = vld [vmem:[%s998_s1 + $0x108] sm:$0xff]  ;;  %v59_v11 = vld [vmem:[%s998_s1 + $0x10] sm:$0xff] }
   0x4   :  { %622 = vmatprep.subr.bf16.mxu0 %v621_v3  ;;  %v653_v12 = vpack.c.bf16 %v90_v10, %v89_v9  ;;  %v60_v13 = vld [vmem:[%s998_s1 + $0x18] sm:$0xff]  ;;  %v77_v14 = vld [vmem:[%s998_s1 + $0xa0] sm:$0xff]  ;;  %v78_v15 = vld [vmem:[%s998_s1 + $0xa8] sm:$0xff] }
   0x5   :  { %624 = vmatpush3.bf16.msra.mxu0 %v623_v7  ;;  %v627_v16 = vpack.c.bf16 %v60_v13, %v59_v11  ;;  %v91_v17 = vld [vmem:[%s998_s1 + $0x110] sm:$0xff]  ;;  %v92_v18 = vld [vmem:[%s998_s1 + $0x118] sm:$0xff]  ;;  %v629_v19 = vpack.c.bf16 %v78_v15, %v77_v14  ;;  %v61_v21 = vld [vmem:[%s998_s1 + $0x20] sm:$0xff] }
   0x6   :  { %626 = vmatprep.subr.bf16.mxu0 %v625_v8  ;;  %654 = vmatprep.subr.bf16.mxu1 %v653_v12  ;;  %v657_v20 = vpack.c.bf16 %v92_v18, %v91_v17  ;;  %v62_v22 = vld [vmem:[%s998_s1 + $0x28] sm:$0xff]  ;;  %v79_v23 = vld [vmem:[%s998_s1 + $0xb0] sm:$0xff]  ;;  %v80_v24 = vld [vmem:[%s998_s1 + $0xb8] sm:$0xff] }
   0x7   :  { %656 = vmatpush3.bf16.msra.mxu1 %v653_v12  ;;  %v93_v25 = vld [vmem:[%s998_s1 + $0x120] sm:$0xff]  ;;  %v94_v26 = vld [vmem:[%s998_s1 + $0x128] sm:$0xff]  ;;  %v631_v28 = vpack.c.bf16 %v62_v22, %v61_v21  ;;  %v95_v29 = vld [vmem:[%s998_s1 + $0x130] sm:$0xff]  ;;  %v633_v31 = vpack.c.bf16 %v80_v24, %v79_v23 }
   0x8   :  { %658 = vmatprep.subr.bf16.mxu1 %v657_v20  ;;  %v661_v27 = vpack.c.bf16 %v94_v26, %v93_v25  ;;  %v96_v30 = vld [vmem:[%s998_s1 + $0x138] sm:$0xff]  ;;  %v63_v32 = vld [vmem:[%s998_s1 + $0x30] sm:$0xff]  ;;  %v81_v34 = vld [vmem:[%s998_s1 + $0xc0] sm:$0xff] }
   0x9   :  { %628 = vmatpush3.bf16.msra.mxu0 %v627_v16  ;;  %v64_v33 = vld [vmem:[%s998_s1 + $0x38] sm:$0xff]  ;;  %v82_v35 = vld [vmem:[%s998_s1 + $0xc8] sm:$0xff]  ;;  %v665_v36 = vpack.c.bf16 %v96_v30, %v95_v29  ;;  %v97_v38 = vld [vmem:[%s998_s1 + $0x140] sm:$0xff] }
   0xa   :  { %630 = vmatprep.subr.bf16.mxu0 %v629_v19  ;;  %v635_v37 = vpack.c.bf16 %v64_v33, %v63_v32  ;;  %v98_v39 = vld [vmem:[%s998_s1 + $0x148] sm:$0xff]  ;;  %v637_v40 = vpack.c.bf16 %v82_v35, %v81_v34  ;;  %v65_v41 = vld [vmem:[%s998_s1 + $0x40] sm:$0xff]  ;;  %v83_v43 = vld [vmem:[%s998_s1 + $0xd0] sm:$0xff] }
   0xb   :  { %660 = vmatpush3.bf16.msra.mxu1 %v657_v20  ;;  %v66_v42 = vld [vmem:[%s998_s1 + $0x48] sm:$0xff]  ;;  %v84_v44 = vld [vmem:[%s998_s1 + $0xd8] sm:$0xff]  ;;  %v669_v45 = vpack.c.bf16 %v98_v39, %v97_v38  ;;  %v853_v46 = vld [vmem:[%s999_s0] sm:$0xff] }
   0xc   :  { %662 = vmatprep.subr.bf16.mxu1 %v661_v27  ;;  %v639_v47 = vpack.c.bf16 %v66_v42, %v65_v41  ;;  %v99_v48 = vld [vmem:[%s998_s1 + $0x150] sm:$0xff]  ;;  %v100_v49 = vld [vmem:[%s998_s1 + $0x158] sm:$0xff]  ;;  %v45_v50 = vrot.slane %v853_v46, 1  ;;  %176 = vmatprep.mubr.f32.mxu0 %v853_v46  ;;  %v24_v51 = vld [vmem:[%s999_s0 + $0x8] sm:$0xff]  ;;  %v641_v52 = vpack.c.bf16 %v84_v44, %v83_v43  ;;  %v32_v15 = vrot.slane %v853_v46, 7 }
   0xd   :  { %632 = vmatpush3.bf16.msra.mxu0 %v631_v28  ;;  %v67_v53 = vld [vmem:[%s998_s1 + $0x50] sm:$0xff]  ;;  %v68_v54 = vld [vmem:[%s998_s1 + $0x58] sm:$0xff]  ;;  %v46_v55 = vrot.slane %v24_v51, 1  ;;  %v85_v56 = vld [vmem:[%s998_s1 + $0xe0] sm:$0xff]  ;;  %v673_v58 = vpack.c.bf16 %v100_v49, %v99_v48  ;;  %v33_v18 = vrot.slane %v24_v51, 7  ;;  %v717_v48 = vmov 0.0  }
   0xe   :  { %634 = vmatprep.subr.bf16.mxu0 %v633_v31  ;;  %v86_v57 = vld [vmem:[%s998_s1 + $0xe8] sm:$0xff]  ;;  %v643_v60 = vpack.c.bf16 %v68_v54, %v67_v53  ;;  %v101_v61 = vld [vmem:[%s998_s1 + $0x160] sm:$0xff]  ;;  %v87_v2 = vld [vmem:[%s998_s1 + $0xf0] sm:$0xff] }
   0xf   :  { %664 = vmatpush3.bf16.msra.mxu1 %v661_v27  ;;  %v47_v59 = vsel %vm44_vm0, %v45_v50, %v46_v55  ;;  %v102_v62 = vld [vmem:[%s998_s1 + $0x168] sm:$0xff]  ;;  %v645_v63 = vpack.c.bf16 %v86_v57, %v85_v56  ;;  %v69_v0 = vld [vmem:[%s998_s1 + $0x60] sm:$0xff]  ;;  %v88_v3 = vld [vmem:[%s998_s1 + $0xf8] sm:$0xff]  ;;  %v34_v20 = vsel %vm31_vm1, %v32_v15, %v33_v18  ;;  %v715_v27 = vmov 0.0|0.0  }
  0x10   :  { %666 = vmatprep.subr.bf16.mxu1 %v665_v36  ;;  %580 = vmatprep.mubr.f32.mxu1 %v47_v59  ;;  %v70_v1 = vld [vmem:[%s998_s1 + $0x68] sm:$0xff]  ;;  %v677_v4 = vpack.c.bf16 %v102_v62, %v101_v61  ;;  %v103_v6 = vld [vmem:[%s998_s1 + $0x170] sm:$0xff]  ;;  %v104_v7 = vld [vmem:[%s998_s1 + $0x178] sm:$0xff]  ;;  %v649_v8 = vpack.c.bf16 %v88_v3, %v87_v2 }
  0x11   :  { %636 = vmatpush3.bf16.msra.mxu0 %v635_v37  ;;  %v647_v5 = vpack.c.bf16 %v70_v1, %v69_v0  ;;  %v71_v9 = vld [vmem:[%s998_s1 + $0x70] sm:$0xff]  ;;  %v72_v10 = vld [vmem:[%s998_s1 + $0x78] sm:$0xff]  ;;  %v681_v11 = vpack.c.bf16 %v104_v7, %v103_v6  ;;  %vm461_vm2 = vmneg %vm31_vm1 }
  0x12   :  { %638 = vmatprep.subr.bf16.mxu0 %v637_v40  ;;  %v651_v12 = vpack.c.bf16 %v72_v10, %v71_v9  ;;  %v26_v13 = vld [vmem:[%s999_s0 + $0x18] sm:$0xff]  ;;  %v25_v14 = vld [vmem:[%s999_s0 + $0x10] sm:$0xff]  ;;  %v305_v24 = vld [vmem:[%s1000_s5] sm:$0xff] }
  0x13   :  { %668 = vmatpush3.bf16.msra.mxu1 %v665_v36  ;;  %v48_v16 = vrot.slane %v25_v14, 1  ;;  %v49_v17 = vrot.slane %v26_v13, 1  ;;  %v35_v21 = vrot.slane %v25_v14, 7  ;;  %v36_v22 = vrot.slane %v26_v13, 7  ;;  %v306_v25 = vld [vmem:[%s1000_s5 + $0x8] sm:$0xff]  ;;  %v307_v28 = vld [vmem:[%s1000_s5 + $0x10] sm:$0xff] }
  0x14   :  { %670 = vmatprep.subr.bf16.mxu1 %v669_v45  ;;  %v686_v26 = vpack.c.bf16 %v306_v25, %v305_v24  ;;  %v308_v29 = vld [vmem:[%s1000_s5 + $0x18] sm:$0xff]  ;;  %v309_v31 = vld [vmem:[%s1000_s5 + $0x20] sm:$0xff]  ;;  %v310_v32 = vld [vmem:[%s1000_s5 + $0x28] sm:$0xff] }
  0x15   :  { %640 = vmatpush3.bf16.msra.mxu0 %v639_v47  ;;  %v50_v19 = vsel %vm44_vm0, %v48_v16, %v49_v17  ;;  %v37_v23 = vsel %vm31_vm1, %v35_v21, %v36_v22  ;;  %v689_v30 = vpack.c.bf16 %v308_v29, %v307_v28  ;;  %v692_v33 = vpack.c.bf16 %v310_v32, %v309_v31  ;;  %v311_v34 = vld [vmem:[%s1000_s5 + $0x30] sm:$0xff]  ;;  %v312_v35 = vld [vmem:[%s1000_s5 + $0x38] sm:$0xff]  ;;  %v313_v37 = vld [vmem:[%s1000_s5 + $0x40] sm:$0xff] }
  0x16   :  { %642 = vmatprep.subr.bf16.mxu0 %v641_v52  ;;  %v695_v36 = vpack.c.bf16 %v312_v35, %v311_v34  ;;  %v314_v38 = vld [vmem:[%s1000_s5 + $0x48] sm:$0xff]  ;;  %v315_v40 = vld [vmem:[%s1000_s5 + $0x50] sm:$0xff]  ;;  %v316_v41 = vld [vmem:[%s1000_s5 + $0x58] sm:$0xff] }
  0x17   :  { %672 = vmatpush3.bf16.msra.mxu1 %v669_v45  ;;  %v698_v39 = vpack.c.bf16 %v314_v38, %v313_v37  ;;  %v701_v42 = vpack.c.bf16 %v316_v41, %v315_v40  ;;  %v317_v43 = vld [vmem:[%s1000_s5 + $0x60] sm:$0xff]  ;;  %v318_v44 = vld [vmem:[%s1000_s5 + $0x68] sm:$0xff]  ;;  %v319_v46 = vld [vmem:[%s1000_s5 + $0x70] sm:$0xff]  ;;  %v718_v40 = vmov 1966171168  }
  0x18   :  { %674 = vmatprep.subr.bf16.mxu1 %v673_v58  ;;  %v704_v45 = vpack.c.bf16 %v318_v44, %v317_v43  ;;  %v320_v47 = vld [vmem:[%s1000_s5 + $0x78] sm:$0xff]  ;;  %v460_v52 = vld [vmem:[%s1001_s2] ss:$0 sm:$0xff]  ;;  %v401_v41 = vunpack.c.l.s4 %v718_v40 }
  0x19   :  { %644 = vmatpush3.bf16.msra.mxu0 %v643_v60  ;;  %v707_v49 = vpack.c.bf16 %v320_v47, %v319_v46 }
  0x1a   :  { %646 = vmatprep.subr.bf16.mxu0 %v645_v63  ;;  %v402_v43 = vunpack.c.0.s8 %v401_v41 }
  0x1b   :  { %676 = vmatpush3.bf16.msra.mxu1 %v673_v58 }
  0x1c   :  { %678 = vmatprep.subr.bf16.mxu1 %v677_v4 }
  0x1d   :  { %648 = vmatpush3.bf16.msra.mxu0 %v647_v5 }
  0x1e   :  { %650 = vmatprep.subr.bf16.mxu0 %v649_v8 }
  0x1f   :  { %680 = vmatpush3.bf16.msra.mxu1 %v677_v4 }
  0x20   :  { %682 = vmatprep.subr.bf16.mxu1 %v681_v11 }
  0x21   :  { %652 = vmatpush3.bf16.msra.mxu0 %v651_v12 }
  0x22   :  { %685 = vmatprep.subr.bf16.mxu0 %v715_v27 }
  0x23   :  { %684 = vmatpush3.bf16.msra.mxu1 %v681_v11 }
  0x24   :  { %462 = vmatmul.mubr.msk.f32.vlgmr.msra.gmra.mrb[0].mxu0 %vm461_vm2, %v32_v15 }
  0x25   :  { %181 = vmatprep.mubr.f32.mxu0 %v24_v51  ;;  %687 = vmatpush3.bf16.msra.mxu0 %v686_v26 }
  0x26   :  { %581 = vmatmul.mubr.msk.f32.vlgmr.msra.gmra.mrb[0].mxu1 %vm44_vm0, %v46_v55  ;;  %688 = vmatprep.subr.bf16.mxu0 %v715_v27 }
  0x27   :  { %583 = vmatprep.mubr.f32.mxu1 %v50_v19 }
  0x28   :  { %182 = vmatmul.mubr.f32.gmra.mrb[2].mxu0 %v34_v20 }
  0x29   :  { %186 = vmatprep.mubr.f32.mxu0 %v25_v14  ;;  %690 = vmatpush3.bf16.msra.mxu0 %v689_v30 }
  0x2a   :  { %584 = vmatmul.mubr.msk.f32.gmra.mrb[2].mxu1 %vm44_vm0, %v49_v17  ;;  %691 = vmatprep.subr.bf16.mxu0 %v715_v27 }
  0x2c   :  { %464 = vmatmul.mubr.msk.f32.gmra.mrb[4].mxu0 %vm461_vm2, %v35_v21 }
  0x2d   :  { %191 = vmatprep.mubr.f32.mxu0 %v26_v13  ;;  %693 = vmatpush3.bf16.msra.mxu0 %v692_v33 }
  0x2e   :  { %694 = vmatprep.subr.bf16.mxu0 %v715_v27 }
  0x30   :  { %192 = vmatmul.mubr.f32.gmra.mrb[6].mxu0 %v37_v23 }
  0x31   :  { %696 = vmatpush3.bf16.msra.mxu0 %v695_v36  ;;  %618 = vmatprep.mubr.msk.f32.mxu0 %vm716_vm3, %v717_v48 }
  0x32   :  { %697 = vmatprep.subr.bf16.mxu0 %v715_v27 }
  0x35   :  { %699 = vmatpush3.bf16.msra.mxu0 %v698_v39 }
  0x36   :  { %700 = vmatprep.subr.bf16.mxu0 %v715_v27 }
  0x39   :  { %702 = vmatpush3.bf16.msra.mxu0 %v701_v42  ;;  %v403_v42 = vlaneseq }
  0x3a   :  { %703 = vmatprep.subr.bf16.mxu0 %v715_v27 }
  0x3b   :  { %v404_v44 = vshrl.u32 %v403_v42, 7 }
  0x3d   :  { %705 = vmatpush3.bf16.msra.mxu0 %v704_v45  ;;  %v405_v45 = vsub.s32 %v402_v43, %v404_v44 }
  0x3e   :  { %706 = vmatprep.subr.bf16.mxu0 %v715_v27 }
  0x41   :  { %708 = vmatpush3.bf16.msra.mxu0 %v707_v49  ;;  %v396_v49 = vld [vmem:[%s1002_s3] sm:$0x1] }
  0xf7   :  { %v499_v50 = vpop.f32.mrb[0].mxu0 }
  0xf8   :  { %v500_v51 = vpop.f32.mrb[1].mxu0 }
  0xf9   :  { %v501_v53 = vadd.f32 %v500_v51, %v499_v50  ;;  %v582_v54 = vpop.f32.mrb[0].mxu1  ;;  %v423_v51 = vsub.s32 0, %v404_v44 }
  0xfa   :  { %v263_v55 = vpop.f32.mrb[1].mxu1 }
  0xfb   :  { %v502_v56 = vpop.f32.mrb[2].mxu0  ;;  %v179_v57 = vadd.f32 %v501_v53, %v460_v52  ;;  %v417_v53 = vld [vmem:[%s1003_s4] sm:$0x1] }
  0xfc   :  { %v503_v58 = vpop.f32.mrb[3].mxu0 }
  0xfd   :  { %v504_v59 = vadd.f32 %v503_v58, %v502_v56  ;;  %v973_v60 = vadd.f32 %v263_v55, %v179_v57  ;;  %v585_v61 = vpop.f32.mrb[2].mxu1 }
  0xfe   :  { %v273_v62 = vpop.f32.mrb[3].mxu1 }
  0xff   :  { %v184_v63 = vadd.f32 %v504_v59, %v460_v52  ;;  %v505_v0 = vpop.f32.mrb[4].mxu0  ;;  %v291_v11 = vmul.f32 %v973_v60, %v973_v60 }
 0x100   :  { %v506_v1 = vpop.f32.mrb[5].mxu0 }
 0x101   :  { %v269_v2 = vadd.f32 %v582_v54, %v184_v63  ;;  %v507_v3 = vadd.f32 %v506_v1, %v505_v0 }
 0x103   :  { %v508_v4 = vpop.f32.mrb[6].mxu0  ;;  %v189_v5 = vadd.f32 %v507_v3, %v460_v52  ;;  %v292_v7 = vmul.f32 %v269_v2, %v269_v2  ;;  %v282_v10 = vadd.f32 %v269_v2, %v973_v60 }
 0x104   :  { %v509_v6 = vpop.f32.mrb[7].mxu0 }
 0x105   :  { %v510_v8 = vadd.f32 %v509_v6, %v508_v4  ;;  %v274_v9 = vadd.f32 %v273_v62, %v189_v5  ;;  %v295_v14 = vadd.f32 %v292_v7, %v291_v11 }
 0x107   :  { %v194_v12 = vadd.f32 %v510_v8, %v460_v52  ;;  %v293_v13 = vmul.f32 %v274_v9, %v274_v9  ;;  %v283_v16 = vadd.f32 %v282_v10, %v274_v9 }
 0x109   :  { %v279_v15 = vadd.f32 %v585_v61, %v194_v12  ;;  %v296_v19 = vadd.f32 %v295_v14, %v293_v13 }
 0x10b   :  { %v294_v17 = vmul.f32 %v279_v15, %v279_v15  ;;  %v284_v18 = vadd.f32 %v283_v16, %v279_v15 }
 0x10d   :  { %v285_v20 = vrot.slane %v284_v18, 4  ;;  %v297_v21 = vadd.f32 %v296_v19, %v294_v17 }
 0x10f   :  { %v286_v22 = vadd.f32 %v285_v20, %v284_v18  ;;  %v298_v23 = vrot.slane %v297_v21, 4 }
 0x111   :  { %v287_v24 = vrot.slane %v286_v22, 2  ;;  %v299_v25 = vadd.f32 %v298_v23, %v297_v21 }
 0x113   :  { %v288_v26 = vadd.f32 %v287_v24, %v286_v22  ;;  %v300_v27 = vrot.slane %v299_v25, 2 }
 0x115   :  { %v289_v28 = vrot.slane %v288_v26, 1  ;;  %v301_v29 = vadd.f32 %v300_v27, %v299_v25 }
 0x117   :  { %v302_v30 = vrot.slane %v301_v29, 1  ;;  %v290_v31 = vadd.f32 %v289_v28, %v288_v26 }
 0x119   :  { %v303_v32 = vadd.f32 %v302_v30, %v301_v29 }
 0x11b   :  { %v304_v33 = vsel %vm31_vm1, %v290_v31, %v303_v32 }
 0x11c   :  { %619 = vmatmul.mubr.f32.vlgmr.msra.gmra.mrb[8].mxu0 %v304_v33 }
 0x1ef   :  { %v387_v34 = vpop.f32.mrb[8].mxu0 }
 0x1f0   :  { %v391_v35 = vmul.f32 %v387_v34, %v387_v34  ;;  %v620_v36 = vpop.f32.mrb[9].mxu0 }
 0x1f2   :  { %v393_v37 = vrot.slane %v391_v35, 7 }
 0x1f4   :  { %v395_v38 = vsub.f32 %v387_v34, %v393_v37 }
 0x1f6   :  { %v397_v39 = vadd.f32 1e-05, %v395_v38 }
 0x1f8   :  { %713 = vrsqrt.f32 %v397_v39 }
 0x202   :  { %v714_v46 = vpop.eup %713 }
 0x203   :  { %v406_v47 = vrot.slane %v714_v46, %v405_v45 }
 0x205   :  { %v407_v48 = vcombine.high %v406_v47, %v406_v47 }
 0x207   :  { %v414_v50 = vrot.slane %v407_v48, %v405_v45 }
 0x209   :  { %v416_v52 = vmul.f32 %v414_v50, %v396_v49 }
 0x20b   :  { %v418_v54 = vmul.f32 %v416_v52, %v387_v34  ;;  %v424_v55 = vrot.slane %v416_v52, %v423_v51 }
 0x20d   :  { %v419_v56 = vsub.f32 %v417_v53, %v418_v54  ;;  %v426_v57 = vmul.f32 %v424_v55, %v973_v60  ;;  %v427_v58 = vmul.f32 %v424_v55, %v269_v2  ;;  %v428_v59 = vmul.f32 %v424_v55, %v274_v9 }
 0x20e   :  { %v429_v61 = vmul.f32 %v424_v55, %v279_v15 }
 0x20f   :  { %v434_v62 = vrot.slane %v419_v56, %v423_v51 }
 0x211   :  { %v436_v63 = vadd.f32 %v434_v62, %v426_v57  ;;  %v437_v0 = vadd.f32 %v434_v62, %v427_v58  ;;  %v438_v1 = vadd.f32 %v434_v62, %v428_v59  ;;  %v439_v3 = vadd.f32 %v434_v62, %v429_v61 }
 0x213   :  { %vm440_vm4 = vcmp.ge.f32.partialorder %v436_v63, 0.0  ;;  %vm441_vm5 = vcmp.ge.f32.partialorder %v437_v0, 0.0  ;;  %vm442_vm6 = vcmp.ge.f32.partialorder %v438_v1, 0.0  ;;  %vm443_vm7 = vcmp.ge.f32.partialorder %v439_v3, 0.0 }
 0x214   :  { %v444_v4 = vmul.f32 0.2, %v436_v63  ;;  %v445_v5 = vmul.f32 0.2, %v437_v0  ;;  %v446_v6 = vmul.f32 0.2, %v438_v1 }
 0x215   :  { %v447_v7 = vmul.f32 0.2, %v439_v3 }
 0x216   :  { %v448_v8 = vsel %vm440_vm4, %v436_v63, %v444_v4  ;;  %v449_v10 = vsel %vm441_vm5, %v437_v0, %v445_v5  ;;  %v450_v11 = vsel %vm442_vm6, %v438_v1, %v446_v6 }
 0x217   :  { %v451_v60 = vsel %vm443_vm7, %v439_v3, %v447_v7  ;;  %452 = vst [vmem:[%s1004_s6] sm:$0xff] %v448_v8  ;;  %453 = vst [vmem:[%s1004_s6 + $0x8] sm:$0xff] %v449_v10 }
 0x218   :  { %454 = vst [vmem:[%s1004_s6 + $0x10] sm:$0xff] %v450_v11  ;;  %455 = vst [vmem:[%s1004_s6 + $0x18] sm:$0xff] %v451_v60 }

</bundles_post_ra>
